<compile_context>
chip_gen: v7x
topology: tpu7x:2x2x1
jax: 0.10.0
libtpu: 0.0.40
codegen_flags: <defaults>
</compile_context>

<pallas_src>
import functools
import math

import jax
import jax.numpy as jnp
from jax.experimental import pallas as pl
from jax.experimental.pallas import tpu as pltpu


_VMEM_LIMIT = 32 * 1024 * 1024  # explicit scoped-VMEM budget (well under v7x 64 MiB physical)


# ------------------------------ tiling helpers --------------------------------
def _choose_tile(dim, preferred, quantum):
    """Largest tile <= preferred that divides dim and is a multiple of quantum,
    otherwise the full dim (block == full array dim is always legal)."""
    if dim <= preferred:
        return dim
    t = (preferred // quantum) * quantum
    while t >= quantum:
        if dim % t == 0:
            return t
        t -= quantum
    return dim


def _pick_time_chunk(T, max_ts=16):
    """Largest divisor of T that is <= max_ts (inner unrolled steps per grid step)."""
    best = 1
    for ts in range(1, min(T, max_ts) + 1):
        if T % ts == 0:
            best = ts
    return best


# ------------------------- tiled GEMM (+bias) kernels --------------------------
def _matmul1_bias_kernel(x_ref, w_ref, b_ref, o_ref):
    x = x_ref[...].astype(w_ref.dtype)                      # bf16 MXU operands
    o_ref[...] = (jnp.dot(x, w_ref[...], preferred_element_type=jnp.float32)
                  + b_ref[...])


def _matmul2_bias_kernel(xa_ref, xb_ref, wa_ref, wb_ref, b_ref, o_ref):
    xa = xa_ref[...].astype(wa_ref.dtype)
    xb = xb_ref[...].astype(wb_ref.dtype)
    o_ref[...] = (jnp.dot(xa, wa_ref[...], preferred_element_type=jnp.float32)
                  + jnp.dot(xb, wb_ref[...], preferred_element_type=jnp.float32)
                  + b_ref[...])


def matmul_bias(x, w, b):
    """(M, K) @ (K, N) + (1, N) -> (M, N) f32, tiled over M and N."""
    M, K = x.shape
    N = w.shape[1]
    tm = _choose_tile(M, 512, 8)
    tn = _choose_tile(N, 512, 128)
    return pl.pallas_call(
        _matmul1_bias_kernel,
        out_shape=jax.ShapeDtypeStruct((M, N), jnp.float32),
        grid=(M // tm, N // tn),
        in_specs=[
            pl.BlockSpec((tm, K), lambda i, j: (i, 0)),
            pl.BlockSpec((K, tn), lambda i, j: (0, j)),
            pl.BlockSpec((1, tn), lambda i, j: (0, j)),
        ],
        out_specs=pl.BlockSpec((tm, tn), lambda i, j: (i, j)),
        compiler_params=pltpu.CompilerParams(
            dimension_semantics=("parallel", "parallel"),
            vmem_limit_bytes=_VMEM_LIMIT),
    )(x, w, b)


def matmul2_bias(xa, xb, wa, wb, b):
    """xa @ wa + xb @ wb + b  ==  [xa | xb] @ [[wa],[wb]] + b.
    Split form so the two LSTM direction streams never get concatenated in HBM."""
    M, Ka = xa.shape
    Kb = xb.shape[1]
    N = wa.shape[1]
    tm = _choose_tile(M, 512, 8)
    tn = _choose_tile(N, 512, 128)
    return pl.pallas_call(
        _matmul2_bias_kernel,
        out_shape=jax.ShapeDtypeStruct((M, N), jnp.float32),
        grid=(M // tm, N // tn),
        in_specs=[
            pl.BlockSpec((tm, Ka), lambda i, j: (i, 0)),
            pl.BlockSpec((tm, Kb), lambda i, j: (i, 0)),
            pl.BlockSpec((Ka, tn), lambda i, j: (0, j)),
            pl.BlockSpec((Kb, tn), lambda i, j: (0, j)),
            pl.BlockSpec((1, tn), lambda i, j: (0, j)),
        ],
        out_specs=pl.BlockSpec((tm, tn), lambda i, j: (i, j)),
        compiler_params=pltpu.CompilerParams(
            dimension_semantics=("parallel", "parallel"),
            vmem_limit_bytes=_VMEM_LIMIT),
    )(xa, xb, wa, wb, b)


# ------------------------------ LSTM scan kernels -------------------------------
def _lstm_cell(gates, c, H):
    """PyTorch gate order i, f, g, o. All elementwise math in f32."""
    i_g = jax.nn.sigmoid(gates[:, 0 * H:1 * H])
    f_g = jax.nn.sigmoid(gates[:, 1 * H:2 * H])
    g_g = jnp.tanh(gates[:, 2 * H:3 * H])
    o_g = jax.nn.sigmoid(gates[:, 3 * H:4 * H])
    c_new = f_g * c + i_g * g_g
    h_new = o_g * jnp.tanh(c_new)
    return h_new, c_new


def _bilstm_chunk_kernel(gf_ref, gb_ref, whf_ref, whb_ref, len_ref,
                         outf_ref, outb_ref,
                         hf_scr, cf_scr, hb_scr, cb_scr, *, ts):
    """Fused fwd+bwd LSTM over one time chunk of TS steps (input gates precomputed)."""
    tc = pl.program_id(0)
    n_chunks = pl.num_programs(0)

    @pl.when(tc == 0)
    def _():
        hf_scr[...] = jnp.zeros_like(hf_scr)
        cf_scr[...] = jnp.zeros_like(cf_scr)
        hb_scr[...] = jnp.zeros_like(hb_scr)
        cb_scr[...] = jnp.zeros_like(cb_scr)

    lens = len_ref[...]              # (B, 1) int32
    whf = whf_ref[...]               # (H, 4H) bf16 — hoisted, grid-invariant
    whb = whb_ref[...]
    H = hf_scr.shape[-1]

    # Fully-unrolled inner time loop (ts is a small static int); recurrent state
    # persists in VMEM scratch across grid steps.
    for s in range(ts):
        # ---- forward direction: actual time t_f = tc*ts + s -------------------
        t_f = tc * ts + s
        h, c = hf_scr[...], cf_scr[...]
        gates = gf_ref[s] + jnp.dot(h.astype(whf.dtype), whf,
                                    preferred_element_type=jnp.float32)
        h_new, c_new = _lstm_cell(gates, c, H)
        m = t_f < lens
        hf_scr[...] = jnp.where(m, h_new, h)
        cf_scr[...] = jnp.where(m, c_new, c)
        outf_ref[s] = jnp.where(m, h_new, jnp.zeros_like(h_new))

        # ---- backward direction: this grid step holds chunk (n_chunks-1-tc);
        #      local index s_b so actual time strictly decreases over the scan.
        s_b = ts - 1 - s
        t_b = (n_chunks - 1 - tc) * ts + s_b
        h, c = hb_scr[...], cb_scr[...]
        gates = gb_ref[s_b] + jnp.dot(h.astype(whb.dtype), whb,
                                      preferred_element_type=jnp.float32)
        h_new, c_new = _lstm_cell(gates, c, H)
        m = t_b < lens
        hb_scr[...] = jnp.where(m, h_new, h)
        cb_scr[...] = jnp.where(m, c_new, c)
        outb_ref[s_b] = jnp.where(m, h_new, jnp.zeros_like(h_new))


def _lstm_chunk_kernel(g_ref, wh_ref, len_ref, out_ref, h_scr, c_scr, *, ts):
    """Unidirectional variant (bidirectional=False)."""
    tc = pl.program_id(0)

    @pl.when(tc == 0)
    def _():
        h_scr[...] = jnp.zeros_like(h_scr)
        c_scr[...] = jnp.zeros_like(c_scr)

    lens = len_ref[...]
    wh = wh_ref[...]
    H = h_scr.shape[-1]
    for s in range(ts):
        t = tc * ts + s
        h, c = h_scr[...], c_scr[...]
        gates = g_ref[s] + jnp.dot(h.astype(wh.dtype), wh,
                                   preferred_element_type=jnp.float32)
        h_new, c_new = _lstm_cell(gates, c, H)
        m = t < lens
        h_scr[...] = jnp.where(m, h_new, h)
        c_scr[...] = jnp.where(m, c_new, c)
        out_ref[s] = jnp.where(m, h_new, jnp.zeros_like(h_new))


def bilstm_scan(gates_f, gates_b, w_hh_f, w_hh_b, lengths_b1, *, ts):
    """Fused bidirectional scan. gates_*: (T, B, 4H) f32, returns two (T, B, H) f32."""
    T, B, G = gates_f.shape
    H = G // 4
    n_chunks = T // ts
    fwd3 = lambda t: (t, 0, 0)
    bwd3 = lambda t: (n_chunks - 1 - t, 0, 0)
    fix2 = lambda t: (0, 0)
    out_f, out_b = pl.pallas_call(
        functools.partial(_bilstm_chunk_kernel, ts=ts),
        out_shape=(jax.ShapeDtypeStruct((T, B, H), jnp.float32),
                   jax.ShapeDtypeStruct((T, B, H), jnp.float32)),
        grid=(n_chunks,),
        in_specs=[
            pl.BlockSpec((ts, B, G), fwd3),      # forward input-gates chunk
            pl.BlockSpec((ts, B, G), bwd3),      # backward input-gates chunk (reversed)
            pl.BlockSpec((H, G), fix2),          # W_hh forward (grid-invariant)
            pl.BlockSpec((H, G), fix2),          # W_hh backward (grid-invariant)
            pl.BlockSpec((B, 1), fix2),          # lengths
        ],
        out_specs=(pl.BlockSpec((ts, B, H), fwd3),
                   pl.BlockSpec((ts, B, H), bwd3)),
        scratch_shapes=[pltpu.VMEM((B, H), jnp.float32) for _ in range(4)],
        compiler_params=pltpu.CompilerParams(
            dimension_semantics=("arbitrary",),   # time recurrence is sequential
            vmem_limit_bytes=_VMEM_LIMIT),
    )(gates_f, gates_b, w_hh_f, w_hh_b, lengths_b1)
    return out_f, out_b


def lstm_scan(gates, w_hh, lengths_b1, *, ts):
    T, B, G = gates.shape
    H = G // 4
    n_chunks = T // ts
    fwd3 = lambda t: (t, 0, 0)
    fix2 = lambda t: (0, 0)
    return pl.pallas_call(
        functools.partial(_lstm_chunk_kernel, ts=ts),
        out_shape=jax.ShapeDtypeStruct((T, B, H), jnp.float32),
        grid=(n_chunks,),
        in_specs=[
            pl.BlockSpec((ts, B, G), fwd3),
            pl.BlockSpec((H, G), fix2),
            pl.BlockSpec((B, 1), fix2),
        ],
        out_specs=pl.BlockSpec((ts, B, H), fwd3),
        scratch_shapes=[pltpu.VMEM((B, H), jnp.float32) for _ in range(2)],
        compiler_params=pltpu.CompilerParams(
            dimension_semantics=("arbitrary",),
            vmem_limit_bytes=_VMEM_LIMIT),
    )(gates, w_hh, lengths_b1)


# ----------------------------------- encoder ------------------------------------
class BaseEncoderPallas:
    def __init__(self, input_size, hidden_size, output_size, n_layers,
                 dropout=0.2, bidirectional=True, key=None):
        if key is None:
            key = jax.random.PRNGKey(0)
        self.input_size = input_size
        self.hidden_size = hidden_size
        self.output_size = output_size
        self.n_layers = n_layers
        self.bidirectional = bidirectional
        self.dropout = dropout  # TODO(synk): nn.LSTM inter-layer dropout is train-only; inference path omits it.

        num_dirs = 2 if bidirectional else 1
        H = hidden_size
        k = 1.0 / math.sqrt(hidden_size)
        self.layers = []
        for layer in range(n_layers):
            d_in = input_size if layer == 0 else num_dirs * hidden_size
            dirs = []
            for _ in range(num_dirs):
                key, k1, k2, k3, k4 = jax.random.split(key, 5)
                w_ih = jax.random.uniform(k1, (d_in, 4 * H), jnp.float32, -k, k)
                w_hh = jax.random.uniform(k2, (H, 4 * H), jnp.float32, -k, k)
                b_ih = jax.random.uniform(k3, (4 * H,), jnp.float32, -k, k)
                b_hh = jax.random.uniform(k4, (4 * H,), jnp.float32, -k, k)
                if layer > 0 and bidirectional:
                    # Split W_ih so the previous layer's out_f / out_b streams feed
                    # two matmuls -> no explicit concat of the two directions.
                    w_ih_parts = (w_ih[:H].astype(jnp.bfloat16),
                                  w_ih[H:].astype(jnp.bfloat16))
                else:
                    w_ih_parts = (w_ih.astype(jnp.bfloat16),)
                dirs.append(dict(w_ih=w_ih_parts,
                                 w_hh=w_hh.astype(jnp.bfloat16),
                                 bias=(b_ih + b_hh).reshape(1, -1)))
            self.layers.append(dirs)

        proj_in = num_dirs * hidden_size
        kp = 1.0 / math.sqrt(proj_in)
        key, k1, k2 = jax.random.split(key, 3)
        w_proj = jax.random.uniform(k1, (proj_in, output_size), jnp.float32, -kp, kp)
        if bidirectional:
            self.w_proj_parts = (w_proj[:H].astype(jnp.bfloat16),
                                 w_proj[H:].astype(jnp.bfloat16))
        else:
            self.w_proj_parts = (w_proj.astype(jnp.bfloat16),)
        self.b_proj = jax.random.uniform(k2, (1, output_size), jnp.float32, -kp, kp)

    def __call__(self, inputs, input_lengths):
        """inputs: (B, T, input_size); input_lengths sorted descending with
        max(input_lengths) == T (matches the pack/pad_packed round trip)."""
        assert inputs.ndim == 3
        B, T, _ = inputs.shape
        H = self.hidden_size
        ts = _pick_time_chunk(T)

        # Single layout change: batch-major -> time-major; all layers run time-major,
        # so every reshape below is contiguous (free).
        x = jnp.transpose(inputs, (1, 0, 2)).astype(jnp.float32)   # (T, B, D)
        lens = input_lengths.reshape(B, 1).astype(jnp.int32)

        feats = [x.reshape(T * B, -1)]      # time-major (T*B, D) activation streams
        for dirs in self.layers:
            gates = []
            for params in dirs:             # hoisted input-gate GEMM per direction
                parts = params["w_ih"]
                if len(parts) == 1:
                    g = matmul_bias(feats[0], parts[0], params["bias"])
                else:
                    g = matmul2_bias(feats[0], feats[1], parts[0], parts[1],
                                     params["bias"])
                gates.append(g.reshape(T, B, 4 * H))
            if self.bidirectional:
                out_f, out_b = bilstm_scan(gates[0], gates[1],
                                           dirs[0]["w_hh"], dirs[1]["w_hh"],
                                           lens, ts=ts)
                feats = [out_f.reshape(T * B, H), out_b.reshape(T * B, H)]
            else:
                out_f = lstm_scan(gates[0], dirs[0]["w_hh"], lens, ts=ts)
                feats = [out_f.reshape(T * B, H)]

        if self.bidirectional:
            logits_flat = matmul2_bias(feats[0], feats[1],
                                       self.w_proj_parts[0], self.w_proj_parts[1],
                                       self.b_proj)
        else:
            logits_flat = matmul_bias(feats[0], self.w_proj_parts[0], self.b_proj)

        logits = jnp.transpose(logits_flat.reshape(T, B, self.output_size),
                               (1, 0, 2))                           # (B, T, out)
        return logits, input_lengths


# ------------------------------------- demo --------------------------------------
if __name__ == "__main__":
    input_size, hidden_size, output_size, n_layers = 8, 16, 10, 2
    B, T = 2, 8

    key = jax.random.PRNGKey(0)
    k_in, k_model = jax.random.split(key)
    inputs = jax.random.normal(k_in, (B, T, input_size), jnp.float32)
    # pack_padded_sequence default enforce_sorted=True -> lengths sorted descending,
    # with max length == T so pad_packed returns the same T.
    input_lengths = jnp.array([8, 5], dtype=jnp.int32)

    enc = BaseEncoderPallas(input_size, hidden_size, output_size, n_layers,
                            dropout=0.2, bidirectional=True, key=k_model)
    logits, lengths_out = enc(inputs, input_lengths)
    jax.block_until_ready(logits)
    jax.block_until_ready(lengths_out)

    assert logits.shape == (B, T, output_size)
    assert lengths_out.shape == (B,)
    print("KERNEL_OK")
</pallas_src>

<mosaic_0001>
module attributes {stable_mosaic.version = 11 : i64} {
  func.func @_matmul1_bias_kernel(%arg0: i32, %arg1: i32, %arg2: memref<16x8xf32, #tpu.memory_space<vmem>>, %arg3: memref<8x64xbf16, #tpu.memory_space<vmem>>, %arg4: memref<1x64xf32, #tpu.memory_space<vmem>>, %arg5: memref<16x64xf32, #tpu.memory_space<vmem>>) attributes {dimension_semantics = [#tpu.dimension_semantics<parallel>, #tpu.dimension_semantics<parallel>], iteration_bounds = array<i64: 1, 1>, scalar_prefetch = 0 : i64, scratch_operands = 0 : i64, tpu.core_type = #tpu.core_type<tc>, window_params = [{transform_indices = @transform_0, window_bounds = array<i64: 16, 8>}, {transform_indices = @transform_1, window_bounds = array<i64: 8, 64>}, {transform_indices = @transform_2, window_bounds = array<i64: 1, 64>}, {transform_indices = @transform_3, window_bounds = array<i64: 16, 64>}]} {
    %c0 = arith.constant 0 : index
    %c0_0 = arith.constant 0 : index
    %0 = vector.load %arg2[%c0, %c0_0] : memref<16x8xf32, #tpu.memory_space<vmem>>, vector<16x8xf32>
    %1 = arith.truncf %0 : vector<16x8xf32> to vector<16x8xbf16>
    %c0_1 = arith.constant 0 : index
    %c0_2 = arith.constant 0 : index
    %2 = vector.load %arg3[%c0_1, %c0_2] : memref<8x64xbf16, #tpu.memory_space<vmem>>, vector<8x64xbf16>
    %cst = arith.constant dense<0.000000e+00> : vector<16x64xf32>
    %3 = tpu.matmul %1, %2, %cst {dimension_numbers = #tpu.dot_dimension_numbers<[1], [0], [0], [1], [0, 0, 1, 1], [], []>} : vector<16x8xbf16>, vector<8x64xbf16>, vector<16x64xf32> -> vector<16x64xf32>
    %c0_3 = arith.constant 0 : index
    %c0_4 = arith.constant 0 : index
    %4 = vector.load %arg4[%c0_3, %c0_4] : memref<1x64xf32, #tpu.memory_space<vmem>>, vector<1x64xf32>
    %5 = vector.broadcast %4 : vector<1x64xf32> to vector<16x64xf32>
    %6 = arith.addf %3, %5 : vector<16x64xf32>
    %c0_5 = arith.constant 0 : index
    %c0_6 = arith.constant 0 : index
    %7 = vector.load %arg5[%c0_5, %c0_6] : memref<16x64xf32, #tpu.memory_space<vmem>>, vector<16x64xf32>
    tpu.vector_store %arg5[%c0_5, %c0_6], %6 {strides = array<i32>} : memref<16x64xf32, #tpu.memory_space<vmem>>, vector<16x64xf32>,
    return
  }
  func.func @transform_0(%arg0: i32, %arg1: i32) -> (i32, i32) {
    %c0_i32 = arith.constant 0 : i32
    %c0_i32_0 = arith.constant 0 : i32
    return %arg0, %c0_i32 : i32, i32
  }
  func.func @transform_1(%arg0: i32, %arg1: i32) -> (i32, i32) {
    %c0_i32 = arith.constant 0 : i32
    %c0_i32_0 = arith.constant 0 : i32
    return %c0_i32, %arg1 : i32, i32
  }
  func.func @transform_2(%arg0: i32, %arg1: i32) -> (i32, i32) {
    %c0_i32 = arith.constant 0 : i32
    %c0_i32_0 = arith.constant 0 : i32
    return %c0_i32, %arg1 : i32, i32
  }
  func.func @transform_3(%arg0: i32, %arg1: i32) -> (i32, i32) {
    %c0_i32 = arith.constant 0 : i32
    return %arg0, %arg1 : i32, i32
  }
}

</mosaic_0001>

<bundles_post_ra>
// kernel: tpu_custom_call.1
= control target key start
LH: loop header
LB: loop body
LE: loop exit
PB: predicated region body
PF: predicated region fallthrough
CT: control target
= control target key end

     0   :  { %vm31_vm0 = vcmask 1043456   ;;  %v134_v2 = vmov 0.0   ;;  %vm135_vm1 = vmmov 0   ;;  %vm27_vm2 = vcmask 64512   ;;  %s183_s0 = inlined_call_operand.vmem [shape: f32[16,8], index: 0, kind: input, shape index: {}]   ;;  %s184_s1 = inlined_call_operand.vmem [shape: bf16[8,64], index: 1, kind: input, shape index: {}]   ;;  %s185_s2 = inlined_call_operand.vmem [shape: f32[1,64], index: 2, kind: input, shape index: {}]   ;;  %s186_s3 = inlined_call_operand.hbm [shape: f32[16,64], index: 3, kind: output, shape index: {}]  }
   0x1   :  { %v19_v0 = vld [vmem:[%s184_s1] sm:$0xf]  ;;  %99 = vmatprep.subr.bf16.mxu0 %v134_v2  ;;  %101 = vmatprep.mubr.msk.bf16.mxu0 %vm135_vm1, %v134_v2  ;;  %v17_v4 = vld [vmem:[%s183_s0 + $0x8] sm:$0xff] }
   0x2   :  { %v16_v1 = vld [vmem:[%s183_s0] sm:$0xff]  ;;  %v33_v3 = vsel %vm31_vm0, %v19_v0, 0 }
   0x3   :  { %100 = vmatpush3.bf16.msra.mxu0 %v33_v3  ;;  %v18_v5 = vpack.c.bf16 %v17_v4, %v16_v1 }
   0x4   :  { %8 = vsyncpa [#allocation3], 0  ;;  %v95_v6 = vld [vmem:[%s185_s2] ss:$0 sm:$0xff]  ;;  %s136_s19 = smov [#allocation2]   ;;  %vm76_vm3 = vcmask 523264  }
   0x5   :  { %s84_s20 = sshll.u32 %s136_s19, 4  ;;  %s85_s20 = int_to_ptr.vmem [resolvable:$true] %s84_s20 }
   0x6   :  { %102 = vmatmul.mubr.msk.bf16.vlgmr.msra.gmra.mrb[0].mxu0 %vm27_vm2, %v18_v5  ;;  %s110_s0 = scalar_lea.vmem %s85_s20, 256  ;;  %p115_p1 = scmp.lt.s32.totalorder %s85_s20, %s85_s20 }
   0x7   :  { %p111_p0 = scmp.ne.s32.totalorder %s85_s20, %s110_s0  ;;  %p116_p2 = scmp.lt.s32.totalorder %s110_s0, %s110_s0 }
   0x9   :  { %p117_p3 = por %p116_p2, %p115_p1 }
   0xb   :  { %p118_p4 = pnand %p117_p3, %p111_p0 }
  0xd9   :  { %v69_v7 = vpop.f32.mrb[0].mxu0 }
  0xda   :  { %v70_v8 = vadd.f32 %v95_v6, %v69_v7  ;;  %v103_v9 = vpop.f32.mrb[1].mxu0 }
  0xdb   :  { %v72_v10 = vpop.f32.mrb[2].mxu0 }
  0xdc   :  { %77 = vst.msk [vmem:[#allocation2] sm:$0xff] %vm76_vm3, %v70_v8  ;;  %v73_v11 = vadd.f32 %v95_v6, %v72_v10  ;;  %v104_v12 = vpop.f32.mrb[3].mxu0 }
  0xde   :  { %78 = vst.msk [vmem:[#allocation2 + $0x8] sm:$0xff] %vm76_vm3, %v73_v11 }
  0xdf   :  { %121 = shalt.err (!%p118_p4)
}
  0xe0   :  { %s122_s22 = scalar_lea.hbm %s186_s3, 256 }
  0xe1   :  { %p123_p5 = scmp.ne.s32.totalorder %s186_s3, %s122_s22  ;;  %p126_p6 = scmp.lt.u32.totalorder %s122_s22, %s186_s3 }
  0xe3   :  { %p128_p7 = pnand %p126_p6, %p123_p5 }
  0xe5   :  { %131 = shalt.err (!%p128_p7)
}
  0xe6   :  { %s137_s27 = smov 128   ;;  %s138_s28 = smov 8  }
  0xe7   :  { %90 = dma.vmem_to_hbm [thread:$0]  %s85_s20, 256, %s186_s3, [#allocation3], %s137_s27, %s137_s27, %s138_s28  }
  0xe8   :  { %132 = dma.done.wait [#allocation3], 256  }
  0xe9   :  { %133 = vsyncadd [#allocation3], 4294967040 }
  0xea   :  { %94 = vsyncpa [#allocation3], 1 }

</bundles_post_ra>
